<compile_context>
chip_gen: v5e
topology: v5e:2x2
jax: 0.10.0
libtpu: 0.0.40
codegen_flags: <defaults>
</compile_context>

<pallas_src>
import jax
import jax.numpy as jnp
from jax import lax
from jax.experimental import pallas as pl
from jax.experimental.pallas import tpu as pltpu


_VMEM_LIMIT_BYTES = 32 * 1024 * 1024       # safe on v5e/v6e (128 MiB) and v7x (64 MiB)
_MAX_FUSED_BLOCK_BYTES = 4 * 1024 * 1024   # per x buffer; ~4x this lives in VMEM
_MAX_MUL_TILE_BYTES = 2 * 1024 * 1024      # per (C, TILE_HW) tile in the two-pass path


def _largest_divisor(n, limit, quantum=1):
    """Largest divisor d of n with d <= limit and d % quantum == 0 (or None)."""
    best = None
    i = 1
    while i * i <= n:
        if n % i == 0:
            for d in (i, n // i):
                if d <= limit and d % quantum == 0 and (best is None or d > best):
                    best = d
        i += 1
    return best


# --------------------------- kernels ---------------------------------------


def _sca_fused_kernel(x_ref, w_ref, b_ref, o_ref):
    # x_ref: (Bt, C, HW)   w_ref: (C, C)   b_ref: (1, C) f32   o_ref: (Bt, C, HW)
    x = x_ref[...]
    # Global average pool; accumulate in f32 regardless of input dtype.
    pool = jnp.mean(x, axis=-1, dtype=jnp.float32)                    # (Bt, C)
    # 1x1 conv over channels: attn[b, d] = sum_c W[d, c] * pool[b, c] + bias[d]
    attn = lax.dot_general(
        pool, w_ref[...].astype(jnp.float32),
        dimension_numbers=(((1,), (1,)), ((), ())),
        preferred_element_type=jnp.float32) + b_ref[...]              # (Bt, C)
    # Broadcast multiply in the input dtype (no full-tile f32 shadow copy).
    o_ref[...] = x * attn.astype(x.dtype)[:, :, None]


def _pool_sum_kernel(x_ref, psum_ref):
    # x_ref: (C, TILE_HW)   psum_ref: (C, 1) f32, resident across the HW-tile axis
    @pl.when(pl.program_id(1) == 0)
    def _():
        psum_ref[...] = jnp.zeros_like(psum_ref)
    psum_ref[...] += jnp.sum(x_ref[...], axis=-1, keepdims=True, dtype=jnp.float32)


def _scale_kernel(x_ref, a_ref, o_ref):
    # x_ref: (C, TILE_HW)   a_ref: (C, 1) in x dtype   o_ref: (C, TILE_HW)
    o_ref[...] = x_ref[...] * a_ref[...]


# --------------------------- wrapper ----------------------------------------


def simple_channel_attention(x_nchw, weight, bias, *,
                             force_two_pass=False,
                             max_fused_block_bytes=_MAX_FUSED_BLOCK_BYTES,
                             max_mul_tile_bytes=_MAX_MUL_TILE_BYTES):
    """x_nchw: (B, C, H, W); weight: (C, C) squeezed 1x1-conv weight; bias: (C,)."""
    B, C, H, W = x_nchw.shape
    HW = H * W
    x_flat = x_nchw.reshape(B, C, HW)
    itemsize = x_nchw.dtype.itemsize
    slab_bytes = C * HW * itemsize            # one batch element, one buffer

    if not force_two_pass and slab_bytes <= max_fused_block_bytes:
        # ---- Fused single-pass: pool + matvec + multiply on a resident slab ----
        bt = _largest_divisor(B, max(1, max_fused_block_bytes // slab_bytes)) or 1
        out_flat = pl.pallas_call(
            _sca_fused_kernel,
            out_shape=jax.ShapeDtypeStruct((B, C, HW), x_nchw.dtype),
            grid=(B // bt,),
            in_specs=[
                pl.BlockSpec((bt, C, HW), lambda i: (i, 0, 0)),
                pl.BlockSpec((C, C), lambda i: (0, 0)),
                pl.BlockSpec((1, C), lambda i: (0, 0)),
            ],
            out_specs=pl.BlockSpec((bt, C, HW), lambda i: (i, 0, 0)),
            compiler_params=pltpu.CompilerParams(
                dimension_semantics=("parallel",),
                vmem_limit_bytes=_VMEM_LIMIT_BYTES),
        )(x_flat, weight, bias.reshape(1, C).astype(jnp.float32))
        return out_flat.reshape(B, C, H, W)

    # ---- Two-pass path for large C*HW (VMEM-budget fallback) ----
    max_tile_hw = max(128, (max_mul_tile_bytes // max(1, C * itemsize)) // 128 * 128)
    tile_hw = (_largest_divisor(HW, max_tile_hw, 128)
               or _largest_divisor(HW, max_tile_hw, 1)
               or HW)
    n_tiles = HW // tile_hw

    # Pass 1: per-(batch, channel) spatial sum (f32 accumulator in the output).
    psum = pl.pallas_call(
        _pool_sum_kernel,
        out_shape=jax.ShapeDtypeStruct((B, C, 1), jnp.float32),
        grid=(B, n_tiles),
        in_specs=[pl.BlockSpec((None, C, tile_hw), lambda b, t: (b, 0, t))],
        out_specs=pl.BlockSpec((None, C, 1), lambda b, t: (b, 0, 0)),
        compiler_params=pltpu.CompilerParams(
            dimension_semantics=("parallel", "arbitrary"),
            vmem_limit_bytes=_VMEM_LIMIT_BYTES),
    )(x_flat)

    # Batched 1x1-conv matvec + bias in plain XLA (tiny; off the hot path).
    pool = psum[:, :, 0] / jnp.float32(HW)                            # (B, C) f32
    attn = pool @ weight.astype(jnp.float32).T + bias.astype(jnp.float32)
    attn = attn.astype(x_nchw.dtype)[:, :, None]                      # (B, C, 1)

    # Pass 2: tiled broadcast multiply; (B, HW-tiles) fully parallel grid.
    out_flat = pl.pallas_call(
        _scale_kernel,
        out_shape=jax.ShapeDtypeStruct((B, C, HW), x_nchw.dtype),
        grid=(B, n_tiles),
        in_specs=[
            pl.BlockSpec((None, C, tile_hw), lambda b, t: (b, 0, t)),
            pl.BlockSpec((None, C, 1), lambda b, t: (b, 0, 0)),
        ],
        out_specs=pl.BlockSpec((None, C, tile_hw), lambda b, t: (b, 0, t)),
        compiler_params=pltpu.CompilerParams(
            dimension_semantics=("parallel", "parallel"),
            vmem_limit_bytes=_VMEM_LIMIT_BYTES),
    )(x_flat, attn)
    return out_flat.reshape(B, C, H, W)


# --------------------------- reference & test --------------------------------


def reference(x_nchw, weight, bias):
    pool = jnp.mean(x_nchw, axis=(2, 3))                  # (B, C)
    attn = pool @ weight.T + bias                         # (B, C)
    return x_nchw * attn[:, :, None, None]


if __name__ == "__main__":
    key = jax.random.PRNGKey(0)
    kx, kw, kb = jax.random.split(key, 3)

    B, C, H, W = 2, 4, 16, 16
    x = jax.random.normal(kx, (B, C, H, W), dtype=jnp.float32)

    # Conv2d(C, C, kernel_size=1): weight (C, C, 1, 1) squeezed to (C, C), bias (C,)
    fan_in = C
    bound = 1.0 / (fan_in ** 0.5)
    weight = jax.random.uniform(kw, (C, C), minval=-bound, maxval=bound,
                                dtype=jnp.float32)
    bias = jax.random.uniform(kb, (C,), minval=-bound, maxval=bound,
                              dtype=jnp.float32)

    ref = reference(x, weight, bias)

    # Fused single-pass path (batch-packed slab).
    out = jax.block_until_ready(simple_channel_attention(x, weight, bias))
    assert out.shape == (B, C, H, W)
    assert jnp.allclose(out, ref, atol=1e-5, rtol=1e-5)

    # Two-pass (tiled pool + tiled broadcast-multiply) fallback, forced with a
    # tiny tile budget so the HW accumulation loop is exercised at small shapes.
    out2 = jax.block_until_ready(
        simple_channel_attention(x, weight, bias, force_two_pass=True,
                                 max_mul_tile_bytes=2048))
    assert jnp.allclose(out2, ref, atol=1e-5, rtol=1e-5)

    print("KERNEL_OK")
</pallas_src>

<mosaic_0001>
module attributes {stable_mosaic.version = 11 : i64} {
  func.func @_sca_fused_kernel(%arg0: i32, %arg1: memref<2x4x256xf32, #tpu.memory_space<vmem>>, %arg2: memref<4x4xf32, #tpu.memory_space<vmem>>, %arg3: memref<1x4xf32, #tpu.memory_space<vmem>>, %arg4: memref<2x4x256xf32, #tpu.memory_space<vmem>>) attributes {dimension_semantics = [#tpu.dimension_semantics<parallel>], iteration_bounds = array<i64: 1>, scalar_prefetch = 0 : i64, scratch_operands = 0 : i64, tpu.core_type = #tpu.core_type<tc>, window_params = [{transform_indices = @transform_0, window_bounds = array<i64: 2, 4, 256>}, {pipeline_mode = #tpu.pipeline_mode<synchronous>, transform_indices = @transform_1, window_bounds = array<i64: 4, 4>}, {pipeline_mode = #tpu.pipeline_mode<synchronous>, transform_indices = @transform_2, window_bounds = array<i64: 1, 4>}, {transform_indices = @transform_3, window_bounds = array<i64: 2, 4, 256>}]} {
    %c0 = arith.constant 0 : index
    %c0_0 = arith.constant 0 : index
    %c0_1 = arith.constant 0 : index
    %0 = vector.load %arg1[%c0, %c0_0, %c0_1] : memref<2x4x256xf32, #tpu.memory_space<vmem>>, vector<2x4x256xf32>
    %cst = arith.constant dense<0.000000e+00> : vector<2x4xf32>
    %1 = vector.multi_reduction <add>, %0, %cst [2] : vector<2x4x256xf32> to vector<2x4xf32>
    %cst_2 = arith.constant 2.560000e+02 : f32
    %2 = vector.broadcast %cst_2 : f32 to vector<2x4xf32>
    %3 = arith.divf %1, %2 : vector<2x4xf32>
    %c0_3 = arith.constant 0 : index
    %c0_4 = arith.constant 0 : index
    %4 = vector.load %arg2[%c0_3, %c0_4] : memref<4x4xf32, #tpu.memory_space<vmem>>, vector<4x4xf32>
    %cst_5 = arith.constant dense<0.000000e+00> : vector<2x4xf32>
    %5 = tpu.matmul %3, %4, %cst_5 {dimension_numbers = #tpu.dot_dimension_numbers<[1], [1], [0], [0], [0, 0, 1, 0], [], []>} : vector<2x4xf32>, vector<4x4xf32>, vector<2x4xf32> -> vector<2x4xf32>
    %c0_6 = arith.constant 0 : index
    %c0_7 = arith.constant 0 : index
    %6 = vector.load %arg3[%c0_6, %c0_7] : memref<1x4xf32, #tpu.memory_space<vmem>>, vector<1x4xf32>
    %7 = vector.broadcast %6 : vector<1x4xf32> to vector<2x4xf32>
    %8 = arith.addf %5, %7 : vector<2x4xf32>
    %9 = vector.shape_cast %8 : vector<2x4xf32> to vector<2x4x1xf32>
    %10 = vector.broadcast %9 : vector<2x4x1xf32> to vector<2x4x256xf32>
    %11 = arith.mulf %0, %10 : vector<2x4x256xf32>
    %c0_8 = arith.constant 0 : index
    %c0_9 = arith.constant 0 : index
    %c0_10 = arith.constant 0 : index
    %12 = vector.load %arg4[%c0_8, %c0_9, %c0_10] : memref<2x4x256xf32, #tpu.memory_space<vmem>>, vector<2x4x256xf32>
    tpu.vector_store %arg4[%c0_8, %c0_9, %c0_10], %11 {strides = array<i32>} : memref<2x4x256xf32, #tpu.memory_space<vmem>>, vector<2x4x256xf32>,
    return
  }
  func.func @transform_0(%arg0: i32) -> (i32, i32, i32) {
    %c0_i32 = arith.constant 0 : i32
    %c0_i32_0 = arith.constant 0 : i32
    %c0_i32_1 = arith.constant 0 : i32
    return %arg0, %c0_i32, %c0_i32_0 : i32, i32, i32
  }
  func.func @transform_1(%arg0: i32) -> (i32, i32) {
    %c0_i32 = arith.constant 0 : i32
    %c0_i32_0 = arith.constant 0 : i32
    %c0_i32_1 = arith.constant 0 : i32
    return %c0_i32, %c0_i32_0 : i32, i32
  }
  func.func @transform_2(%arg0: i32) -> (i32, i32) {
    %c0_i32 = arith.constant 0 : i32
    %c0_i32_0 = arith.constant 0 : i32
    %c0_i32_1 = arith.constant 0 : i32
    return %c0_i32, %c0_i32_0 : i32, i32
  }
  func.func @transform_3(%arg0: i32) -> (i32, i32, i32) {
    %c0_i32 = arith.constant 0 : i32
    %c0_i32_0 = arith.constant 0 : i32
    %c0_i32_1 = arith.constant 0 : i32
    return %arg0, %c0_i32, %c0_i32_0 : i32, i32, i32
  }
}

</mosaic_0001>

<bundles_post_ra>
// kernel: tpu_custom_call.1
= control target key start
LH: loop header
LB: loop body
LE: loop exit
PB: predicated region body
PF: predicated region fallthrough
CT: control target
= control target key end

     0   :  { %8 = vsyncpa [#allocation3], 0  ;;  %s308_s0 = inlined_call_operand.hbm [shape: f32[2,4,256], index: 0, kind: input, shape index: {}]   ;;  %s309_s1 = inlined_call_operand.hbm [shape: f32[4,4], index: 1, kind: input, shape index: {}]   ;;  %s310_s2 = inlined_call_operand.vmem [shape: f32[1,4], index: 2, kind: input, shape index: {}]   ;;  %s311_s3 = inlined_call_operand.hbm [shape: f32[2,4,256], index: 3, kind: output, shape index: {}]  }
   0x1   :  { %9 = vsyncpa [#allocation6], 0 }
   0x2   :  { %10 = vsyncpa [#allocation4], 0  ;;  %s15_s14 = sshll.u32 %s308_s0, 4  ;;  %s261_s15 = smov [#allocation2]   ;;  %s16_s14 = int_to_ptr.hbm [resolvable:$true] %s15_s14 }
   0x3   :  { %s17_s16 = sshll.u32 %s261_s15, 4  ;;  %s29_s19 = sshll.u32 %s309_s1, 4  ;;  %s18_s16 = int_to_ptr.vmem [resolvable:$true] %s17_s16  ;;  %s30_s19 = int_to_ptr.hbm [resolvable:$true] %s29_s19 }
   0x4   :  { %s262_s20 = smov 128   ;;  %s263_s21 = smov 8  }
   0x5   :  { %23 = dma.hbm_to_vmem [thread:$0]  %s16_s14, 256, %s18_s16, [#allocation3], %s262_s20, %s262_s20, %s263_s21  }
   0x6   :  { %s264_s22 = smov [#allocation5]  }
   0x7   :  { %s31_s23 = sshll.u32 %s264_s22, 4  ;;  %s32_s23 = int_to_ptr.vmem [resolvable:$true] %s31_s23 }
   0x8   :  { %34 = dma.hbm_to_vmem [thread:$0]  %s30_s19, 64, %s32_s23, [#allocation6]  }
   0x9   :  { %255 = dma.done.wait [#allocation3], 256  }
   0xa   :  { %256 = vsyncadd [#allocation3], 4294967040 }
   0xb   :  { %257 = dma.done.wait [#allocation6], 64  }
   0xc   :  { %258 = vsyncadd [#allocation6], 4294967232  ;;  %v45_v0 = vld [vmem:[#allocation2] sm:$0xff]  ;;  %v46_v1 = vld [vmem:[#allocation2 + $0x8] sm:$0xff]  ;;  %vm60_vm0 = vcmask 1043456   ;;  %vm93_vm1 = vcmask 31744   ;;  %v87_v14 = vlaneseq }
   0xd   :  { %49 = vst [vmem:[#allocation1] ss:$2 sm:$0xff] %v45_v0  ;;  %v80_v12 = vld [vmem:[#allocation5] sm:$0xf]  ;;  %v265_v13 = vmov 256.0   ;;  %vm91_vm3 = vcmask 1041409  }
   0xe   :  { %53 = vst [vmem:[#allocation1 + $0x10] ss:$2 sm:$0xff] %v46_v1  ;;  %181 = vrcp.f32 %v265_v13  ;;  %169 = vmatpush.xpose.msk.msra.mxu0 %vm93_vm1, %v80_v12  ;;  %v121_v15 = vshrl.u32 %v87_v14, 7  ;;  %v88_v23 = vand.u32 127, %v87_v14  ;;  %v180_v30 = vld [vmem:[%s310_s2] ss:$0 sm:$0xff] }
   0xf   :  { %v266_v35 = vmov 839922192   ;;  %s267_s24 = smov [#allocation7]   ;;  %s155_s2 = sshll.u32 %s311_s3, 4  ;;  %s156_s2 = int_to_ptr.hbm [resolvable:$true] %s155_s2 }
  0x10   :  { %178 = vset.pattern.permute.xlu1 %v121_v15  ;;  %179 = vset.pattern.permute.xlu0 %v121_v15  ;;  %v136_v36 = vunpack.c.l.s4 %v266_v35  ;;  %s153_s25 = sshll.u32 %s267_s24, 4  ;;  %s154_s25 = int_to_ptr.vmem [resolvable:$true] %s153_s25 }
  0x12   :  { %v137_v37 = vunpack.c.0.s8 %v136_v36 }
  0x14   :  { %v50_v2 = vld.sshfl [vmem:[#allocation1] sm:$0xff pattern:$0x75316420]  ;;  %v51_v3 = vld.sshfl [vmem:[#allocation1 + $0x8] sm:$0xff pattern:$0x75316420]  ;;  %v182_v16 = vpop.eup %181 }
  0x15   :  { %v61_v4 = vsel %vm60_vm0, %v50_v2, 0.0  ;;  %v62_v5 = vsel %vm60_vm0, %v51_v3, 0.0  ;;  %v54_v7 = vld.sshfl [vmem:[#allocation1 + $0x10] sm:$0xff pattern:$0x75316420]  ;;  %v72_v17 = vmul.f32 256.0, %v182_v16  ;;  %vm76_vm2 = vweird.f32 %v182_v16 }
  0x16   :  { %v63_v6 = vadd.f32 %v62_v5, %v61_v4  ;;  %v55_v8 = vld.sshfl [vmem:[#allocation1 + $0x18] sm:$0xff pattern:$0x75316420]  ;;  %v66_v9 = vsel %vm60_vm0, %v54_v7, 0.0 }
  0x17   :  { %v67_v10 = vsel %vm60_vm0, %v55_v8, 0.0  ;;  %v73_v18 = vsub.f32 1.0, %v72_v17 }
  0x18   :  { %64 = vadd.xlane.f32.xlu0 %v63_v6  ;;  %v68_v11 = vadd.f32 %v67_v10, %v66_v9 }
  0x19   :  { %v74_v19 = vmul.f32 %v182_v16, %v73_v18 }
  0x1b   :  { %v75_v20 = vadd.f32 %v182_v16, %v74_v19 }
  0x1d   :  { %v77_v22 = vsel %vm76_vm2, %v182_v16, %v75_v20 }
  0x20   :  { %69 = vadd.xlane.f32.xlu0 %v68_v11 }
  0x8b   :  { %v65_v21 = vpop.xlane.xlu0 %64 }
  0x8c   :  { %v78_v24 = vmul.f32 %v77_v22, %v65_v21 }
  0x8e   :  { %v89_v27 = vperm.slane %v78_v24, %v88_v23 }
  0x93   :  { %v70_v25 = vpop.xlane.xlu0 %69 }
  0x94   :  { %v79_v26 = vmul.f32 %v77_v22, %v70_v25 }
  0x96   :  { %v90_v28 = vperm.slane %v79_v26, %v88_v23 }
  0x98   :  { %v92_v29 = vsel %vm91_vm3, %v90_v28, %v89_v27 }
  0x99   :  { %170 = vmatmul.msk.f32.vlgmr.msra.gmra.mxu0 %vm93_vm1, %v92_v29 }
 0x116   :  { %v116_v31 = vpop.f32.mrf.mxu0 }
 0x117   :  { %v117_v32 = vadd.f32 %v180_v30, %v116_v31 }
 0x119   :  { %v119_v33 = vperm.slane %v117_v32, 0  ;;  %v126_v34 = vperm.slane %v117_v32, 1 }
 0x11b   :  { %124 = vperm.xlu1 %178, %v119_v33  }
 0x123   :  { %131 = vperm.xlu1 %178, %v126_v34  }
 0x18d   :  { %v125_v38 = vpop.permute.xlu1 %124 }
 0x18e   :  { %v138_v39 = vperm.slane %v125_v38, %v137_v37 }
 0x190   :  { %v145_v40 = vmul.f32 %v138_v39, %v45_v0 }
 0x192   :  { %147 = vst [vmem:[#allocation7] sm:$0xff] %v145_v40 }
 0x195   :  { %v132_v41 = vpop.permute.xlu1 %131 }
 0x196   :  { %v142_v42 = vperm.slane %v132_v41, %v137_v37 }
 0x198   :  { %v146_v43 = vmul.f32 %v142_v42, %v46_v1 }
 0x19a   :  { %148 = vst [vmem:[#allocation7 + $0x8] sm:$0xff] %v146_v43 }
 0x19b   :  { %161 = dma.vmem_to_hbm [thread:$0]  %s154_s25, 256, %s156_s2, [#allocation4], %s262_s20, %s262_s20, %s263_s21  }
 0x19c   :  { %259 = dma.done.wait [#allocation4], 256  }
 0x19d   :  { %260 = vsyncadd [#allocation4], 4294967040 }
 0x19e   :  { %166 = vsyncpa [#allocation3], 1 }
 0x19f   :  { %167 = vsyncpa [#allocation6], 1 }
 0x1a0   :  { %168 = vsyncpa [#allocation4], 1 }

</bundles_post_ra>
